<compile_context>
chip_gen: v6e
topology: v6e:2x2x1
jax: 0.10.0
libtpu: 0.0.40
codegen_flags: <defaults>
</compile_context>

<pallas_src>
import jax
import jax.numpy as jnp
from jax.experimental import pallas as pl
from jax.experimental.pallas import tpu as pltpu


def _round_up(n, m):
    return ((n + m - 1) // m) * m


def _ntm_lstm_seq_kernel(
    gx_ref,      # [B, 4H]   f32  x @ W_ih^T + (b_ih + b_hh), block for step t
    h0_ref,      # [B, H]    f32  initial hidden state (VMEM-resident)
    c0_ref,      # [B, H]    f32  initial cell state   (VMEM-resident)
    w_hh_ref,    # [H, 4H]   f32  recurrent weight     (VMEM-resident)
    w_op_ref,    # [H, OPp]  f32  fused [W_out^T | W_p^T] (zero-padded, resident)
    b_op_ref,    # [1, OPp]  f32  fused [b_out | b_p]     (zero-padded, resident)
    op_ref,      # [B, OPp]  f32  per-step output slab: [out | params | pad]
    h_out_ref,   # [B, H]    f32  final hidden state (written on last step)
    c_out_ref,   # [B, H]    f32  final cell state   (written on last step)
    h_scr,       # [B, H]    f32  VMEM scratch: hidden-state carry
    c_scr,       # [B, H]    f32  VMEM scratch: cell-state carry
):
    t = pl.program_id(0)
    H = h_scr.shape[1]

    # Load the caller's state into the carried scratch on the first step only.
    @pl.when(t == 0)
    def _():
        h_scr[...] = h0_ref[...]
        c_scr[...] = c0_ref[...]

    # Recurrent gate contribution: [B,H] @ [H,4H] on the MXU, f32 accumulate.
    gates = gx_ref[...] + jnp.dot(
        h_scr[...], w_hh_ref[...], preferred_element_type=jnp.float32)

    # Whole-slab transcendentals: 2 full-vreg EUP passes instead of 4
    # quarter-lane ones.  Gate order [i, f, g, o].
    sig = jax.nn.sigmoid(gates)
    tnh = jnp.tanh(gates)

    i_g = sig[:, 0 * H:1 * H]
    f_g = sig[:, 1 * H:2 * H]
    g_g = tnh[:, 2 * H:3 * H]
    o_g = sig[:, 3 * H:4 * H]

    c_new = f_g * c_scr[...] + i_g * g_g
    h_new = o_g * jnp.tanh(c_new)

    # Carry the state in VMEM scratch across grid steps (no HBM round trip,
    # no per-step slab assembly / lane concatenate).
    h_scr[...] = h_new
    c_scr[...] = c_new

    # Fused fc_out + param_gen: one lane-dense [B, OP_pad] matmul + one
    # unmasked 128-lane store per step.
    op_ref[...] = (
        jnp.dot(h_new, w_op_ref[...], preferred_element_type=jnp.float32)
        + b_op_ref[...])

    # Final state written once, on the last step.
    @pl.when(t == pl.num_programs(0) - 1)
    def _():
        h_out_ref[...] = h_new
        c_out_ref[...] = c_new


def ntm_controller_lstm_seq(xs, state, params):
    """Run the controller over a whole sequence with one pallas_call.

    Args:
      xs:     [T, B, input_size] float32
      state:  (hx, cx), each [B, controller_size] float32
      params: dict from make_params.
    Returns:
      (out [T,B,O], gen_params [T,B,P], (hx_new, cx_new))
    """
    hx, cx = state
    T, B, _ = xs.shape
    H = hx.shape[1]
    O = params["output_size"]
    P = params["param_size"]
    OP_pad = params["w_op"].shape[1]

    # Hoist the input projection out of the recurrence: one big lane-dense
    # matmul over the whole sequence (output width 4H == 128 lanes).
    gx = (jnp.einsum("tbi,ik->tbk", xs, params["w_ih_t"],
                     precision=jax.lax.Precision.HIGHEST)
          + params["b_gates"])

    op_seq, h_new, c_new = pl.pallas_call(
        _ntm_lstm_seq_kernel,
        out_shape=(
            jax.ShapeDtypeStruct((T, B, OP_pad), jnp.float32),
            jax.ShapeDtypeStruct((B, H), jnp.float32),
            jax.ShapeDtypeStruct((B, H), jnp.float32),
        ),
        grid_spec=pltpu.PrefetchScalarGridSpec(
            num_scalar_prefetch=0,
            grid=(T,),
            in_specs=[
                pl.BlockSpec((None, B, 4 * H), lambda t: (t, 0, 0)),  # gx[t]
                pl.BlockSpec((B, H), lambda t: (0, 0)),               # h0
                pl.BlockSpec((B, H), lambda t: (0, 0)),               # c0
                pl.BlockSpec((H, 4 * H), lambda t: (0, 0)),           # W_hh^T
                pl.BlockSpec((H, OP_pad), lambda t: (0, 0)),          # W_op
                pl.BlockSpec((1, OP_pad), lambda t: (0, 0)),          # b_op
            ],
            out_specs=(
                pl.BlockSpec((None, B, OP_pad), lambda t: (t, 0, 0)),  # out/params
                pl.BlockSpec((B, H), lambda t: (0, 0)),                # h final
                pl.BlockSpec((B, H), lambda t: (0, 0)),                # c final
            ),
            scratch_shapes=[
                pltpu.VMEM((B, H), jnp.float32),   # h carry
                pltpu.VMEM((B, H), jnp.float32),   # c carry
            ],
        ),
        compiler_params=pltpu.CompilerParams(
            dimension_semantics=("arbitrary",)),   # time is a true recurrence
    )(gx, hx, cx, params["w_hh_t"], params["w_op"], params["b_op"])

    out = op_seq[..., :O]
    gen = op_seq[..., O:O + P]
    return out, gen, (h_new, c_new)


def ntm_controller_lstm(x, state, params):
    """Single step — exact semantics of NTMControllerLSTM.forward(x, state)."""
    out, gen, new_state = ntm_controller_lstm_seq(x[None], state, params)
    return out[0], gen[0], new_state


def make_params(key, input_size, controller_size, output_size, param_size):
    """Deterministic parameter init (shapes match the PyTorch module). All f32."""
    H = controller_size
    ks = jax.random.split(key, 8)
    scale = 0.1
    # PyTorch layouts: W_ih [4H, In], W_hh [4H, H], W_out [O, H], W_p [P, H].
    w_ih = scale * jax.random.normal(ks[0], (4 * H, input_size), jnp.float32)
    w_hh = scale * jax.random.normal(ks[1], (4 * H, H), jnp.float32)
    b_ih = scale * jax.random.normal(ks[2], (4 * H,), jnp.float32)
    b_hh = scale * jax.random.normal(ks[3], (4 * H,), jnp.float32)
    w_out = scale * jax.random.normal(ks[4], (output_size, H), jnp.float32)
    b_out = scale * jax.random.normal(ks[5], (output_size,), jnp.float32)
    w_p = scale * jax.random.normal(ks[6], (param_size, H), jnp.float32)
    b_p = scale * jax.random.normal(ks[7], (param_size,), jnp.float32)

    # Fused output weight: [H, O+P], zero-padded to a 128-lane multiple (f32).
    OP = output_size + param_size
    OP_pad = _round_up(OP, 128)
    w_op = jnp.concatenate([w_out.T, w_p.T], axis=1)          # [H, O+P]
    w_op = jnp.pad(w_op, ((0, 0), (0, OP_pad - OP)))
    b_op = jnp.pad(jnp.concatenate([b_out, b_p]), (0, OP_pad - OP))[None, :]

    return {
        "w_ih_t": w_ih.T,               # [In, 4H]     f32
        "w_hh_t": w_hh.T,               # [H, 4H]      f32
        "b_gates": b_ih + b_hh,         # [4H]         f32
        "w_op": w_op,                   # [H, OP_pad]  f32
        "b_op": b_op,                   # [1, OP_pad]  f32
        "output_size": output_size,
        "param_size": param_size,
        # Raw copies for the pure-JAX reference check.
        "_raw": dict(w_ih=w_ih, w_hh=w_hh, b_ih=b_ih, b_hh=b_hh,
                     w_out=w_out, b_out=b_out, w_p=w_p, b_p=b_p),
    }


def reference_step(x, state, params):
    """Pure-JAX f32 reference of the PyTorch forward (single step)."""
    p = params["_raw"]
    hx, cx = state
    H = hx.shape[1]
    hp = jax.lax.Precision.HIGHEST
    gates = (jnp.dot(x, p["w_ih"].T, precision=hp)
             + jnp.dot(hx, p["w_hh"].T, precision=hp)
             + (p["b_ih"] + p["b_hh"])[None, :])
    i = jax.nn.sigmoid(gates[:, 0 * H:1 * H])
    f = jax.nn.sigmoid(gates[:, 1 * H:2 * H])
    g = jnp.tanh(gates[:, 2 * H:3 * H])
    o = jax.nn.sigmoid(gates[:, 3 * H:4 * H])
    c_new = f * cx + i * g
    h_new = o * jnp.tanh(c_new)
    out = jnp.dot(h_new, p["w_out"].T, precision=hp) + p["b_out"][None, :]
    gen = jnp.dot(h_new, p["w_p"].T, precision=hp) + p["b_p"][None, :]
    return out, gen, (h_new, c_new)


def reference_seq(xs, state, params):
    outs, gens = [], []
    for t in range(xs.shape[0]):
        out, gen, state = reference_step(xs[t], state, params)
        outs.append(out)
        gens.append(gen)
    return jnp.stack(outs), jnp.stack(gens), state


if __name__ == "__main__":
    # Small shapes consistent with the module's forward.
    B, input_size, controller_size, output_size, param_size = 8, 16, 32, 16, 24
    T = 8

    key = jax.random.PRNGKey(0)
    k_x, k_h, k_c, k_p = jax.random.split(key, 4)

    xs = jax.random.normal(k_x, (T, B, input_size), jnp.float32)
    hx = jax.random.normal(k_h, (B, controller_size), jnp.float32)
    cx = jax.random.normal(k_c, (B, controller_size), jnp.float32)
    params = make_params(k_p, input_size, controller_size, output_size,
                         param_size)

    tol = dict(atol=2e-3, rtol=2e-3)

    # 1) Single step — exact semantics of NTMControllerLSTM.forward.
    out, gen, (h1, c1) = ntm_controller_lstm(xs[0], (hx, cx), params)
    jax.block_until_ready((out, gen, h1, c1))
    r_out, r_gen, (r_h1, r_c1) = reference_step(xs[0], (hx, cx), params)
    assert jnp.allclose(out, r_out, **tol), "out mismatch (step)"
    assert jnp.allclose(gen, r_gen, **tol), "params mismatch (step)"
    assert jnp.allclose(h1, r_h1, **tol), "hx mismatch (step)"
    assert jnp.allclose(c1, r_c1, **tol), "cx mismatch (step)"

    # 2) Sequence stepping — grid-over-time with resident weights and
    #    scratch-carried state (the perf-motivated usage).
    s_out, s_gen, (sh, scx) = ntm_controller_lstm_seq(xs, (hx, cx), params)
    jax.block_until_ready((s_out, s_gen, sh, scx))
    rs_out, rs_gen, (rsh, rsc) = reference_seq(xs, (hx, cx), params)
    assert jnp.allclose(s_out, rs_out, **tol), "out mismatch (seq)"
    assert jnp.allclose(s_gen, rs_gen, **tol), "params mismatch (seq)"
    assert jnp.allclose(sh, rsh, **tol), "hx mismatch (seq)"
    assert jnp.allclose(scx, rsc, **tol), "cx mismatch (seq)"

    print("KERNEL_OK")
</pallas_src>

<mosaic_0001>
module attributes {stable_mosaic.version = 11 : i64} {
  func.func @_ntm_lstm_seq_kernel(%arg0: i32, %arg1: memref<1x8x128xf32, #tpu.memory_space<vmem>>, %arg2: memref<8x32xf32, #tpu.memory_space<vmem>>, %arg3: memref<8x32xf32, #tpu.memory_space<vmem>>, %arg4: memref<32x128xf32, #tpu.memory_space<vmem>>, %arg5: memref<32x128xf32, #tpu.memory_space<vmem>>, %arg6: memref<1x128xf32, #tpu.memory_space<vmem>>, %arg7: memref<1x8x128xf32, #tpu.memory_space<vmem>>, %arg8: memref<8x32xf32, #tpu.memory_space<vmem>>, %arg9: memref<8x32xf32, #tpu.memory_space<vmem>>, %arg10: memref<8x32xf32, #tpu.memory_space<vmem>>, %arg11: memref<8x32xf32, #tpu.memory_space<vmem>>) attributes {dimension_semantics = [#tpu.dimension_semantics<arbitrary>], iteration_bounds = array<i64: 1>, scalar_prefetch = 0 : i64, scratch_operands = 2 : i64, tpu.core_type = #tpu.core_type<tc>, window_params = [{transform_indices = @transform_0, window_bounds = array<i64: 1, 8, 128>}, {pipeline_mode = #tpu.pipeline_mode<synchronous>, transform_indices = @transform_1, window_bounds = array<i64: 8, 32>}, {pipeline_mode = #tpu.pipeline_mode<synchronous>, transform_indices = @transform_2, window_bounds = array<i64: 8, 32>}, {pipeline_mode = #tpu.pipeline_mode<synchronous>, transform_indices = @transform_3, window_bounds = array<i64: 32, 128>}, {pipeline_mode = #tpu.pipeline_mode<synchronous>, transform_indices = @transform_4, window_bounds = array<i64: 32, 128>}, {pipeline_mode = #tpu.pipeline_mode<synchronous>, transform_indices = @transform_5, window_bounds = array<i64: 1, 128>}, {transform_indices = @transform_6, window_bounds = array<i64: 1, 8, 128>}, {pipeline_mode = #tpu.pipeline_mode<synchronous>, transform_indices = @transform_7, window_bounds = array<i64: 8, 32>}, {pipeline_mode = #tpu.pipeline_mode<synchronous>, transform_indices = @transform_8, window_bounds = array<i64: 8, 32>}]} {
    %c0_i32 = arith.constant 0 : i32
    %0 = arith.cmpi eq, %arg0, %c0_i32 : i32
    %1 = arith.extui %0 : i1 to i32
    %c0_i32_0 = arith.constant 0 : i32
    %2 = arith.cmpi ne, %1, %c0_i32_0 : i32
    scf.if %2 {
      %c0_24 = arith.constant 0 : index
      %c0_25 = arith.constant 0 : index
      %38 = vector.load %arg2[%c0_24, %c0_25] : memref<8x32xf32, #tpu.memory_space<vmem>>, vector<8x32xf32>
      %c0_26 = arith.constant 0 : index
      %c0_27 = arith.constant 0 : index
      %39 = vector.load %arg10[%c0_26, %c0_27] : memref<8x32xf32, #tpu.memory_space<vmem>>, vector<8x32xf32>
      tpu.vector_store %arg10[%c0_26, %c0_27], %38 {strides = array<i32>} : memref<8x32xf32, #tpu.memory_space<vmem>>, vector<8x32xf32>,
      %c0_28 = arith.constant 0 : index
      %c0_29 = arith.constant 0 : index
      %40 = vector.load %arg3[%c0_28, %c0_29] : memref<8x32xf32, #tpu.memory_space<vmem>>, vector<8x32xf32>
      %c0_30 = arith.constant 0 : index
      %c0_31 = arith.constant 0 : index
      %41 = vector.load %arg11[%c0_30, %c0_31] : memref<8x32xf32, #tpu.memory_space<vmem>>, vector<8x32xf32>
      tpu.vector_store %arg11[%c0_30, %c0_31], %40 {strides = array<i32>} : memref<8x32xf32, #tpu.memory_space<vmem>>, vector<8x32xf32>,
    } else {
    }
    %c0 = arith.constant 0 : index
    %c0_1 = arith.constant 0 : index
    %c0_2 = arith.constant 0 : index
    %3 = vector.load %arg1[%c0, %c0_1, %c0_2] : memref<1x8x128xf32, #tpu.memory_space<vmem>>, vector<1x8x128xf32>
    %4 = vector.shape_cast %3 : vector<1x8x128xf32> to vector<8x128xf32>
    %c0_3 = arith.constant 0 : index
    %c0_4 = arith.constant 0 : index
    %5 = vector.load %arg10[%c0_3, %c0_4] : memref<8x32xf32, #tpu.memory_space<vmem>>, vector<8x32xf32>
    %c0_5 = arith.constant 0 : index
    %c0_6 = arith.constant 0 : index
    %6 = vector.load %arg4[%c0_5, %c0_6] : memref<32x128xf32, #tpu.memory_space<vmem>>, vector<32x128xf32>
    %cst = arith.constant dense<0.000000e+00> : vector<8x128xf32>
    %7 = tpu.matmul %5, %6, %cst {dimension_numbers = #tpu.dot_dimension_numbers<[1], [0], [0], [1], [0, 0, 1, 1], [], []>} : vector<8x32xf32>, vector<32x128xf32>, vector<8x128xf32> -> vector<8x128xf32>
    %8 = arith.addf %4, %7 : vector<8x128xf32>
    %9 = arith.negf %8 : vector<8x128xf32>
    %10 = math.exp %9 : vector<8x128xf32>
    %cst_7 = arith.constant 1.000000e+00 : f32
    %11 = vector.broadcast %cst_7 : f32 to vector<8x128xf32>
    %12 = arith.addf %11, %10 : vector<8x128xf32>
    %13 = arith.divf %11, %12 : vector<8x128xf32>
    %14 = math.tanh %8 : vector<8x128xf32>
    %15 = vector.extract_strided_slice %13 {offsets = [0, 0], sizes = [8, 32], strides = [1, 1]} : vector<8x128xf32> to vector<8x32xf32>
    %16 = vector.extract_strided_slice %13 {offsets = [0, 32], sizes = [8, 32], strides = [1, 1]} : vector<8x128xf32> to vector<8x32xf32>
    %17 = vector.extract_strided_slice %14 {offsets = [0, 64], sizes = [8, 32], strides = [1, 1]} : vector<8x128xf32> to vector<8x32xf32>
    %18 = vector.extract_strided_slice %13 {offsets = [0, 96], sizes = [8, 32], strides = [1, 1]} : vector<8x128xf32> to vector<8x32xf32>
    %c0_8 = arith.constant 0 : index
    %c0_9 = arith.constant 0 : index
    %19 = vector.load %arg11[%c0_8, %c0_9] : memref<8x32xf32, #tpu.memory_space<vmem>>, vector<8x32xf32>
    %20 = arith.mulf %16, %19 : vector<8x32xf32>
    %21 = arith.mulf %15, %17 : vector<8x32xf32>
    %22 = arith.addf %20, %21 : vector<8x32xf32>
    %23 = math.tanh %22 : vector<8x32xf32>
    %24 = arith.mulf %18, %23 : vector<8x32xf32>
    %c0_10 = arith.constant 0 : index
    %c0_11 = arith.constant 0 : index
    %25 = vector.load %arg10[%c0_10, %c0_11] : memref<8x32xf32, #tpu.memory_space<vmem>>, vector<8x32xf32>
    tpu.vector_store %arg10[%c0_10, %c0_11], %24 {strides = array<i32>} : memref<8x32xf32, #tpu.memory_space<vmem>>, vector<8x32xf32>,
    %c0_12 = arith.constant 0 : index
    %c0_13 = arith.constant 0 : index
    %26 = vector.load %arg11[%c0_12, %c0_13] : memref<8x32xf32, #tpu.memory_space<vmem>>, vector<8x32xf32>
    tpu.vector_store %arg11[%c0_12, %c0_13], %22 {strides = array<i32>} : memref<8x32xf32, #tpu.memory_space<vmem>>, vector<8x32xf32>,
    %c0_14 = arith.constant 0 : index
    %c0_15 = arith.constant 0 : index
    %27 = vector.load %arg5[%c0_14, %c0_15] : memref<32x128xf32, #tpu.memory_space<vmem>>, vector<32x128xf32>
    %cst_16 = arith.constant dense<0.000000e+00> : vector<8x128xf32>
    %28 = tpu.matmul %24, %27, %cst_16 {dimension_numbers = #tpu.dot_dimension_numbers<[1], [0], [0], [1], [0, 0, 1, 1], [], []>} : vector<8x32xf32>, vector<32x128xf32>, vector<8x128xf32> -> vector<8x128xf32>
    %c0_17 = arith.constant 0 : index
    %c0_18 = arith.constant 0 : index
    %29 = vector.load %arg6[%c0_17, %c0_18] : memref<1x128xf32, #tpu.memory_space<vmem>>, vector<1x128xf32>
    %30 = vector.broadcast %29 : vector<1x128xf32> to vector<8x128xf32>
    %31 = arith.addf %28, %30 : vector<8x128xf32>
    %c0_19 = arith.constant 0 : index
    %c0_20 = arith.constant 0 : index
    %c0_21 = arith.constant 0 : index
    %32 = vector.load %arg7[%c0_19, %c0_20, %c0_21] : memref<1x8x128xf32, #tpu.memory_space<vmem>>, vector<1x8x128xf32>
    %33 = vector.shape_cast %32 : vector<1x8x128xf32> to vector<8x128xf32>
    %34 = vector.shape_cast %31 : vector<8x128xf32> to vector<1x8x128xf32>
    tpu.vector_store %arg7[%c0_19, %c0_20, %c0_21], %34 {strides = array<i32>} : memref<1x8x128xf32, #tpu.memory_space<vmem>>, vector<1x8x128xf32>,
    %c0_i32_22 = arith.constant 0 : i32
    %35 = arith.cmpi eq, %arg0, %c0_i32_22 : i32
    %36 = arith.extui %35 : i1 to i32
    %c0_i32_23 = arith.constant 0 : i32
    %37 = arith.cmpi ne, %36, %c0_i32_23 : i32
    scf.if %37 {
      %c0_24 = arith.constant 0 : index
      %c0_25 = arith.constant 0 : index
      %38 = vector.load %arg8[%c0_24, %c0_25] : memref<8x32xf32, #tpu.memory_space<vmem>>, vector<8x32xf32>
      tpu.vector_store %arg8[%c0_24, %c0_25], %24 {strides = array<i32>} : memref<8x32xf32, #tpu.memory_space<vmem>>, vector<8x32xf32>,
      %c0_26 = arith.constant 0 : index
      %c0_27 = arith.constant 0 : index
      %39 = vector.load %arg9[%c0_26, %c0_27] : memref<8x32xf32, #tpu.memory_space<vmem>>, vector<8x32xf32>
      tpu.vector_store %arg9[%c0_26, %c0_27], %22 {strides = array<i32>} : memref<8x32xf32, #tpu.memory_space<vmem>>, vector<8x32xf32>,
    } else {
    }
    return
  }
  func.func @transform_0(%arg0: i32) -> (i32, i32, i32) {
    %c0_i32 = arith.constant 0 : i32
    %c0_i32_0 = arith.constant 0 : i32
    %c0_i32_1 = arith.constant 0 : i32
    return %arg0, %c0_i32, %c0_i32_0 : i32, i32, i32
  }
  func.func @transform_1(%arg0: i32) -> (i32, i32) {
    %c0_i32 = arith.constant 0 : i32
    %c0_i32_0 = arith.constant 0 : i32
    %c0_i32_1 = arith.constant 0 : i32
    return %c0_i32, %c0_i32_0 : i32, i32
  }
  func.func @transform_2(%arg0: i32) -> (i32, i32) {
    %c0_i32 = arith.constant 0 : i32
    %c0_i32_0 = arith.constant 0 : i32
    %c0_i32_1 = arith.constant 0 : i32
    return %c0_i32, %c0_i32_0 : i32, i32
  }
  func.func @transform_3(%arg0: i32) -> (i32, i32) {
    %c0_i32 = arith.constant 0 : i32
    %c0_i32_0 = arith.constant 0 : i32
    %c0_i32_1 = arith.constant 0 : i32
    return %c0_i32, %c0_i32_0 : i32, i32
  }
  func.func @transform_4(%arg0: i32) -> (i32, i32) {
    %c0_i32 = arith.constant 0 : i32
    %c0_i32_0 = arith.constant 0 : i32
    %c0_i32_1 = arith.constant 0 : i32
    return %c0_i32, %c0_i32_0 : i32, i32
  }
  func.func @transform_5(%arg0: i32) -> (i32, i32) {
    %c0_i32 = arith.constant 0 : i32
    %c0_i32_0 = arith.constant 0 : i32
    %c0_i32_1 = arith.constant 0 : i32
    return %c0_i32, %c0_i32_0 : i32, i32
  }
  func.func @transform_6(%arg0: i32) -> (i32, i32, i32) {
    %c0_i32 = arith.constant 0 : i32
    %c0_i32_0 = arith.constant 0 : i32
    %c0_i32_1 = arith.constant 0 : i32
    return %arg0, %c0_i32, %c0_i32_0 : i32, i32, i32
  }
  func.func @transform_7(%arg0: i32) -> (i32, i32) {
    %c0_i32 = arith.constant 0 : i32
    %c0_i32_0 = arith.constant 0 : i32
    %c0_i32_1 = arith.constant 0 : i32
    return %c0_i32, %c0_i32_0 : i32, i32
  }
  func.func @transform_8(%arg0: i32) -> (i32, i32) {
    %c0_i32 = arith.constant 0 : i32
    %c0_i32_0 = arith.constant 0 : i32
    %c0_i32_1 = arith.constant 0 : i32
    return %c0_i32, %c0_i32_0 : i32, i32
  }
}

</mosaic_0001>

<bundles_post_ra>
// kernel: tpu_custom_call.1
= control target key start
LH: loop header
LB: loop body
LE: loop exit
PB: predicated region body
PF: predicated region fallthrough
CT: control target
= control target key end

     0   :  { %14 = vsyncpa [#allocation5], 0  ;;  %s687_s0 = inlined_call_operand.hbm [shape: f32[1,8,128], index: 0, kind: input, shape index: {}]   ;;  %s688_s1 = inlined_call_operand.hbm [shape: f32[8,32], index: 1, kind: input, shape index: {}]   ;;  %s689_s2 = inlined_call_operand.hbm [shape: f32[8,32], index: 2, kind: input, shape index: {}]   ;;  %s690_s3 = inlined_call_operand.hbm [shape: f32[32,128], index: 3, kind: input, shape index: {}]   ;;  %s691_s4 = inlined_call_operand.hbm [shape: f32[32,128], index: 4, kind: input, shape index: {}]   ;;  %s692_s5 = inlined_call_operand.vmem [shape: f32[1,128], index: 5, kind: input, shape index: {}]   ;;  %s693_s6 = inlined_call_operand.hbm [shape: f32[1,8,128], index: 6, kind: output, shape index: {0}]   ;;  %s694_s7 = inlined_call_operand.hbm [shape: f32[8,32], index: 7, kind: output, shape index: {1}]   ;;  %s695_s8 = inlined_call_operand.hbm [shape: f32[8,32], index: 8, kind: output, shape index: {2}]  }
   0x1   :  { %15 = vsyncpa [#allocation8], 0 }
   0x2   :  { %16 = vsyncpa [#allocation11], 0 }
   0x3   :  { %17 = vsyncpa [#allocation6], 0 }
   0x4   :  { %18 = vsyncpa [#allocation15], 0  ;;  %s581_s27 = smov [#allocation7]   ;;  %s582_s29 = smov [#allocation10]  }
   0x5   :  { %s35_s28 = sshll.u32 %s581_s27, 4  ;;  %s54_s30 = sshll.u32 %s582_s29, 4  ;;  %s36_s28 = int_to_ptr.vmem [resolvable:$true] %s35_s28  ;;  %s55_s30 = int_to_ptr.vmem [resolvable:$true] %s54_s30 }
   0x6   :  { %s419_s9 = scalar_lea.vmem %s36_s28, 128  ;;  %p424_p1 = scmp.lt.s32.totalorder %s36_s28, %s36_s28 }
   0x7   :  { %p420_p0 = scmp.ne.s32.totalorder %s36_s28, %s419_s9  ;;  %p425_p2 = scmp.lt.s32.totalorder %s419_s9, %s419_s9 }
   0x9   :  { %p426_p3 = por %p425_p2, %p424_p1 }
   0xb   :  { %p427_p4 = pnand %p426_p3, %p420_p0 }
   0xd   :  { %430 = shalt.err (!%p427_p4)
}
   0xe   :  { %38 = dma.hbm_to_vmem [thread:$0]  %s688_s1, 128, %s36_s28, [#allocation8]  }
   0xf   :  { %s439_s12 = scalar_lea.vmem %s55_s30, 512  ;;  %p444_p6 = scmp.lt.s32.totalorder %s55_s30, %s55_s30 }
  0x10   :  { %p440_p5 = scmp.ne.s32.totalorder %s55_s30, %s439_s12  ;;  %p445_p7 = scmp.lt.s32.totalorder %s439_s12, %s439_s12 }
  0x12   :  { %p446_p8 = por %p445_p7, %p444_p6 }
  0x14   :  { %p447_p9 = pnand %p446_p8, %p440_p5 }
  0x16   :  { %450 = shalt.err (!%p447_p9)
}
  0x17   :  { %s583_s13 = smov 128   ;;  %s584_s14 = smov 8  }
  0x18   :  { %60 = dma.hbm_to_vmem [thread:$0]  %s690_s3, 512, %s55_s30, [#allocation11], %s583_s13, %s583_s13, %s584_s14  }
  0x19   :  { %s585_s17 = smov [#allocation4]   ;;  %s586_s19 = smov [#allocation9]  }
  0x1a   :  { %s25_s18 = sshll.u32 %s585_s17, 4  ;;  %s45_s1 = sshll.u32 %s586_s19, 4  ;;  %s26_s18 = int_to_ptr.vmem [resolvable:$true] %s25_s18  ;;  %s46_s1 = int_to_ptr.vmem [resolvable:$true] %s45_s1 }
  0x1b   :  { %s459_s20 = scalar_lea.vmem %s26_s18, 128  ;;  %p464_p11 = scmp.lt.s32.totalorder %s26_s18, %s26_s18 }
  0x1c   :  { %p460_p10 = scmp.ne.s32.totalorder %s26_s18, %s459_s20  ;;  %p465_p12 = scmp.lt.s32.totalorder %s459_s20, %s459_s20 }
  0x1e   :  { %p466_p13 = por %p465_p12, %p464_p11 }
  0x20   :  { %p467_p0 = pnand %p466_p13, %p460_p10 }
  0x22   :  { %470 = shalt.err (!%p467_p0)
}
  0x23   :  { %28 = dma.hbm_to_vmem [thread:$0]  %s687_s0, 128, %s26_s18, [#allocation5]  }
  0x24   :  { %s479_s23 = scalar_lea.vmem %s46_s1, 128  ;;  %p484_p2 = scmp.lt.s32.totalorder %s46_s1, %s46_s1 }
  0x25   :  { %p480_p1 = scmp.ne.s32.totalorder %s46_s1, %s479_s23  ;;  %p485_p3 = scmp.lt.s32.totalorder %s479_s23, %s479_s23 }
  0x27   :  { %p486_p4 = por %p485_p3, %p484_p2 }
  0x29   :  { %p487_p5 = pnand %p486_p4, %p480_p1 }
  0x2b   :  { %490 = shalt.err (!%p487_p5)
}
  0x2c   :  { %48 = dma.hbm_to_vmem [thread:$0]  %s689_s2, 128, %s46_s1, [#allocation8]  }
  0x2d   :  { %s587_s25 = smov [#allocation12]  }
  0x2e   :  { %s66_s26 = sshll.u32 %s587_s25, 4  ;;  %s67_s26 = int_to_ptr.vmem [resolvable:$true] %s66_s26 }
  0x2f   :  { %s499_s27 = scalar_lea.vmem %s67_s26, 512  ;;  %p504_p7 = scmp.lt.s32.totalorder %s67_s26, %s67_s26 }
  0x30   :  { %p500_p6 = scmp.ne.s32.totalorder %s67_s26, %s499_s27  ;;  %p505_p8 = scmp.lt.s32.totalorder %s499_s27, %s499_s27 }
  0x32   :  { %p506_p9 = por %p505_p8, %p504_p7 }
  0x34   :  { %p507_p10 = pnand %p506_p9, %p500_p6 }
  0x36   :  { %510 = shalt.err (!%p507_p10)
}
  0x37   :  { %72 = dma.hbm_to_vmem [thread:$0]  %s691_s4, 512, %s67_s26, [#allocation11], %s583_s13, %s583_s13, %s584_s14  }
  0x38   :  { %571 = dma.done.wait [#allocation5], 128  }
  0x39   :  { %572 = vsyncadd [#allocation5], 4294967168 }
  0x3a   :  { %573 = dma.done.wait [#allocation8], 256  }
  0x3b   :  { %574 = vsyncadd [#allocation8], 4294967040 }
  0x3c   :  { %575 = dma.done.wait [#allocation11], 1024  }
  0x3d   :  { %576 = vsyncadd [#allocation11], 4294966272  ;;  %v588_v0 = vmov 0.0   ;;  %vm589_vm0 = vmmov 0   ;;  %vm95_vm1 = vcmask 261120   ;;  %v104_v1 = vld [vmem:[#allocation10 + $0x18] sm:$0xff] }
  0x3e   :  { %366 = vmatprep.subr.mxu0 %v588_v0  ;;  %374 = vmatprep.mubr.msk.f32.mxu0 %vm589_vm0, %v588_v0  ;;  %v103_v2 = vld [vmem:[#allocation10 + $0x10] sm:$0xff]  ;;  %v97_v4 = vld [vmem:[#allocation9] sm:$0xff]  ;;  %v102_v5 = vld [vmem:[#allocation10 + $0x8] sm:$0xff]  ;;  %s590_s2 = smov 64   ;;  %s591_s4 = smov 32  }
  0x3f   :  { %377 = vmatprep.subr.mxu1 %v588_v0  ;;  %385 = vmatprep.mubr.msk.f32.mxu1 %vm589_vm0, %v588_v0  ;;  %v94_v3 = vld [vmem:[#allocation7] sm:$0xff]  ;;  %98 = vst.msk [vmem:[#allocation3] sm:$0xff] %vm95_vm1, %v97_v4  ;;  %v101_v6 = vld [vmem:[#allocation10] sm:$0xff]  ;;  %v99_v8 = vld [vmem:[#allocation4] sm:$0xff]  ;;  %s592_s29 = smov 96   ;;  %s593_s30 = smov [#allocation14]  }
  0x40   :  { %367 = vmatpush3.msra.mxu0 %v104_v1  ;;  %96 = vst.msk [vmem:[#allocation2] sm:$0xff] %vm95_vm1, %v94_v3  ;;  %v222_v24 = vld [vmem:[#allocation12 + $0x18] sm:$0xff]  ;;  %v221_v25 = vld [vmem:[#allocation12 + $0x10] sm:$0xff]  ;;  %v220_v26 = vld [vmem:[#allocation12 + $0x8] sm:$0xff]  ;;  %s324_s9 = sshll.u32 %s593_s30, 4  ;;  %s325_s9 = int_to_ptr.vmem [resolvable:$true] %s324_s9 }
  0x41   :  { %368 = vmatprep.subr.mxu0 %v588_v0  ;;  %378 = vmatpush3.msra.mxu1 %v222_v24  ;;  %v219_v27 = vld [vmem:[#allocation12] sm:$0xff]  ;;  %s511_s10 = scalar_lea.vmem %s325_s9, 128  ;;  %p516_p12 = scmp.lt.s32.totalorder %s325_s9, %s325_s9 }
  0x42   :  { %369 = vmatpush3.msra.mxu0 %v103_v2  ;;  %379 = vmatprep.subr.mxu1 %v588_v0  ;;  %p512_p11 = scmp.ne.s32.totalorder %s325_s9, %s511_s10  ;;  %p517_p13 = scmp.lt.s32.totalorder %s511_s10, %s511_s10 }
  0x43   :  { %370 = vmatprep.subr.mxu0 %v588_v0  ;;  %380 = vmatpush3.msra.mxu1 %v221_v25 }
  0x44   :  { %371 = vmatpush3.msra.mxu0 %v102_v5  ;;  %381 = vmatprep.subr.mxu1 %v588_v0  ;;  %p518_p0 = por %p517_p13, %p516_p12 }
  0x45   :  { %372 = vmatprep.subr.mxu0 %v588_v0  ;;  %382 = vmatpush3.msra.mxu1 %v220_v26 }
  0x46   :  { %373 = vmatpush3.msra.mxu0 %v101_v6  ;;  %v187_v13 = vld [vmem:[#allocation3] sm:$0xff]  ;;  %383 = vmatprep.subr.mxu1 %v588_v0  ;;  %p519_p1 = pnand %p518_p0, %p512_p11 }
  0x47   :  { %v100_v7 = vld [vmem:[#allocation2] sm:$0xff]  ;;  %384 = vmatpush3.msra.mxu1 %v219_v27 }
  0x48   :  { %375 = vmatmul.mubr.msk.f32.vlgmr.msra.gmra.mxu0 %vm95_vm1, %v100_v7 }
 0x108   :  { %v175_v9 = vpop.f32.mrf.mxu0 }
 0x109   :  { %v179_v10 = vadd.f32 %v175_v9, %v99_v8 }
 0x10a   :  { %v376_v11 = vpop.f32.mrf.mxu0 }
 0x10b   :  { %403 = vtanh.f32 %v179_v10  ;;  %v353_v14 = vmul.f32 -1.442695, %v179_v10 }
 0x10d   :  { %405 = vpow2.f32 %v353_v14 }
 0x118   :  { %v404_v12 = vpop.eup %403 }
 0x119   :  { %194 = vrot.lane.b32.xlu0 %v404_v12, %s590_s2 }
 0x11a   :  { %v406_v15 = vpop.eup %405 }
 0x11b   :  { %v183_v16 = vadd.f32 1.0, %v406_v15 }
 0x11d   :  { %189 = vrot.lane.b32.xlu0 %v187_v13, %s591_s4  ;;  %407 = vrcp.f32 %v183_v16 }
 0x12a   :  { %v408_v17 = vpop.eup %407 }
 0x18b   :  { %v195_v18 = vpop.permute.xlu0 %194 }
 0x18c   :  { %v197_v19 = vmul.f32 %v408_v17, %v195_v18 }
 0x18e   :  { %199 = vrot.lane.b32.xlu1 %v197_v19, %s591_s4 }
 0x18f   :  { %v190_v20 = vpop.permute.xlu0 %189 }
 0x190   :  { %v192_v21 = vmul.f32 %v408_v17, %v190_v20 }
 0x200   :  { %v200_v22 = vpop.permute.xlu1 %199 }
 0x201   :  { %v202_v23 = vadd.f32 %v200_v22, %v192_v21 }
 0x203   :  { %409 = vtanh.f32 %v202_v23 }
 0x210   :  { %v410_v28 = vpop.eup %409 }
 0x211   :  { %205 = vrot.lane.b32.xlu1 %v410_v28, %s590_s2 }
 0x215   :  { %215 = vrot.lane.b32.xlu1 %v202_v23, %s592_s29 }
 0x283   :  { %v206_v29 = vpop.permute.xlu1 %205 }
 0x284   :  { %v208_v30 = vmul.f32 %v408_v17, %v206_v29 }
 0x286   :  { %210 = vrot.lane.b32.xlu0 %v208_v30, %s591_s4 }
 0x287   :  { %v216_v31 = vpop.permute.xlu1 %215 }
 0x288   :  { %218 = vst.msk [vmem:[#allocation3] sm:$0xff] %vm95_vm1, %v216_v31  ;;  %307 = vst.msk [vmem:[#allocation16] sm:$0xff] %vm95_vm1, %v216_v31 }
 0x2f8   :  { %v211_v32 = vpop.permute.xlu0 %210 }
 0x2f9   :  { %213 = vst.msk [vmem:[#allocation2] sm:$0xff] %vm95_vm1, %v211_v32  ;;  %306 = vst.msk [vmem:[#allocation14] sm:$0xff] %vm95_vm1, %v211_v32  ;;  %386 = vmatmul.mubr.msk.f32.vlgmr.msra.gmra.mxu1 %vm95_vm1, %v211_v32 }
 0x2fa   :  { %522 = shalt.err (!%p519_p1)
}
 0x2fb   :  { %327 = dma.vmem_to_hbm [thread:$0]  %s325_s9, 128, %s694_s7, [#allocation15]  }
 0x2fc   :  { %s594_s13 = smov [#allocation16]  }
 0x2fd   :  { %s334_s14 = sshll.u32 %s594_s13, 4  ;;  %s335_s14 = int_to_ptr.vmem [resolvable:$true] %s334_s14 }
 0x2fe   :  { %s531_s15 = scalar_lea.vmem %s335_s14, 128  ;;  %p536_p3 = scmp.lt.s32.totalorder %s335_s14, %s335_s14 }
 0x2ff   :  { %p532_p2 = scmp.ne.s32.totalorder %s335_s14, %s531_s15  ;;  %p537_p4 = scmp.lt.s32.totalorder %s531_s15, %s531_s15 }
 0x301   :  { %p538_p5 = por %p537_p4, %p536_p3 }
 0x303   :  { %p539_p6 = pnand %p538_p5, %p532_p2 }
 0x305   :  { %542 = shalt.err (!%p539_p6)
}
 0x306   :  { %337 = dma.vmem_to_hbm [thread:$0]  %s335_s14, 128, %s695_s8, [#allocation15]   ;;  %v354_v33 = vld [vmem:[%s692_s5] ss:$0 sm:$0xff] }
 0x307   :  { %s595_s1 = smov [#allocation13]  }
 0x308   :  { %s314_s7 = sshll.u32 %s595_s1, 4  ;;  %s315_s7 = int_to_ptr.vmem [resolvable:$true] %s314_s7 }
 0x309   :  { %s551_s20 = scalar_lea.vmem %s315_s7, 128  ;;  %p556_p8 = scmp.lt.s32.totalorder %s315_s7, %s315_s7 }
 0x30a   :  { %p552_p7 = scmp.ne.s32.totalorder %s315_s7, %s551_s20  ;;  %p557_p9 = scmp.lt.s32.totalorder %s551_s20, %s551_s20 }
 0x30c   :  { %p558_p10 = por %p557_p9, %p556_p8 }
 0x30e   :  { %p559_p11 = pnand %p558_p10, %p552_p7 }
 0x3b9   :  { %v298_v34 = vpop.f32.mrf.mxu1 }
 0x3ba   :  { %v299_v35 = vadd.f32 %v354_v33, %v298_v34 }
 0x3bb   :  { %v387_v36 = vpop.f32.mrf.mxu1 }
 0x3bc   :  { %302 = vst [vmem:[#allocation13] sm:$0xff] %v299_v35 }
 0x3bd   :  { %562 = shalt.err (!%p559_p11)
}
 0x3be   :  { %317 = dma.vmem_to_hbm [thread:$0]  %s315_s7, 128, %s693_s6, [#allocation6]  }
 0x3bf   :  { %577 = dma.done.wait [#allocation6], 128  }
 0x3c0   :  { %578 = vsyncadd [#allocation6], 4294967168 }
 0x3c1   :  { %579 = dma.done.wait [#allocation15], 256  }
 0x3c2   :  { %580 = vsyncadd [#allocation15], 4294967040 }
 0x3c3   :  { %347 = vsyncpa [#allocation5], 1 }
 0x3c4   :  { %348 = vsyncpa [#allocation8], 1 }
 0x3c5   :  { %349 = vsyncpa [#allocation11], 1 }
 0x3c6   :  { %350 = vsyncpa [#allocation6], 1 }
 0x3c7   :  { %351 = vsyncpa [#allocation15], 1 }

</bundles_post_ra>
